<compile_context>
chip_gen: v7x
topology: tpu7x:2x2x1
jax: 0.10.0
libtpu: 0.0.40
codegen_flags: <defaults>
</compile_context>

<pallas_src>
import jax
import jax.numpy as jnp
from jax.experimental import pallas as pl
from jax.experimental.pallas import tpu as pltpu


def _round_up(x, m):
    return ((x + m - 1) // m) * m


def _multitask_kernel(u_ref, q_ref, q0_ref, a_ref, b_ref,
                      w1a_ref, w1b_ref, w1c_ref, b1_ref,
                      w2_ref, b2_ref, w3_ref, b3_ref,
                      out_ref):
    bf16 = jnp.bfloat16

    u = u_ref[...]            # (TB, D) f32
    q = q_ref[...]            # (TB, D) f32
    uq = u * q                # f32 on the VPU

    # predictions = (u @ q.T)[:, 0] + a + b  ==  <u_i, q_0> + a_i + b_i
    # VPU multiply + XLU lane reduce -> free filler under the MXU-bound MLP.
    pred = (jnp.sum(u * q0_ref[...], axis=-1, keepdims=True)
            + a_ref[...] + b_ref[...])                               # (TB, 1) f32

    # rating_net layer 1: concat([u, q, u*q]) @ W1 + b1, expressed as three K=D
    # matmuls that accumulate into the same f32 result (no concat / retile).
    h1 = (jnp.dot(u.astype(bf16),  w1a_ref[...], preferred_element_type=jnp.float32)
          + jnp.dot(q.astype(bf16), w1b_ref[...], preferred_element_type=jnp.float32)
          + jnp.dot(uq.astype(bf16), w1c_ref[...], preferred_element_type=jnp.float32)
          + b1_ref[...])
    h1 = jnp.maximum(h1, 0.0)                                        # (TB, H1) f32

    # layer 2 on the MXU (bf16 in / f32 acc).
    h2 = jnp.dot(h1.astype(bf16), w2_ref[...],
                 preferred_element_type=jnp.float32) + b2_ref[...]
    h2 = jnp.maximum(h2, 0.0)                                        # (TB, H2) f32

    # final (H2 -> 1) layer: VPU multiply + lane reduction instead of an N=1 MXU pass.
    score = jnp.sum(h2 * w3_ref[...], axis=-1, keepdims=True) + b3_ref[...]  # (TB, 1)

    # single lane-packed (TB, 2) store: [:, 0] = predictions, [:, 1] = score
    out_ref[...] = jnp.concatenate([pred, score], axis=-1)


def multitask_net_forward(user_ids, item_ids, params, *, block_b=512):
    """Runs the MultiTaskNet forward pass. Returns (predictions, score), both (B, 1)."""
    # --- glue: embedding gathers in plain JAX ---
    u = params["user_embedding"][user_ids]       # (B, D)
    q = params["item_embedding"][item_ids]       # (B, D)
    a = params["user_bias"][user_ids]            # (B, 1)
    b = params["item_bias"][item_ids]            # (B, 1)

    B, D = u.shape
    q0 = q[0:1, :]                               # global row 0 of q (matches (u @ q.T)[:, 0])

    bf16 = jnp.bfloat16
    w1 = params["w1"]                            # (3D, H1)
    w1a = w1[:D, :].astype(bf16)                 # (D, H1)
    w1b = w1[D:2 * D, :].astype(bf16)            # (D, H1)
    w1c = w1[2 * D:, :].astype(bf16)             # (D, H1)
    b1 = params["b1"]                            # (1, H1) f32
    w2 = params["w2"].astype(bf16)               # (H1, H2)
    b2 = params["b2"]                            # (1, H2) f32
    w3 = params["w3"].reshape(1, -1)             # (1, H2) f32 (VPU path)
    b3 = params["b3"].reshape(1, 1)              # (1, 1)  f32

    H1 = w1.shape[1]
    H2 = w2.shape[1]

    # Batch tiling: multiple of 8 sublanes, capped so double-buffered tiles stay
    # far under v7x's 64 MiB VMEM; pad batch so the grid divides evenly.
    TB = min(block_b, _round_up(B, 8))
    B_pad = _round_up(B, TB)
    if B_pad != B:
        pad = ((0, B_pad - B), (0, 0))
        u = jnp.pad(u, pad)
        q = jnp.pad(q, pad)
        a = jnp.pad(a, pad)
        b = jnp.pad(b, pad)

    grid = (pl.cdiv(B_pad, TB),)
    batch_spec = lambda w: pl.BlockSpec((TB, w), lambda i: (i, 0))
    const_spec = lambda s: pl.BlockSpec(s, lambda i: (0, 0))   # VMEM-resident across grid

    out = pl.pallas_call(
        _multitask_kernel,
        out_shape=jax.ShapeDtypeStruct((B_pad, 2), jnp.float32),
        grid=grid,
        in_specs=[
            batch_spec(D),            # u
            batch_spec(D),            # q
            const_spec((1, D)),       # q0 (global first item row)
            batch_spec(1),            # a
            batch_spec(1),            # b
            const_spec((D, H1)),      # w1a
            const_spec((D, H1)),      # w1b
            const_spec((D, H1)),      # w1c
            const_spec((1, H1)),      # b1
            const_spec((H1, H2)),     # w2
            const_spec((1, H2)),      # b2
            const_spec((1, H2)),      # w3 (row layout, VPU reduce)
            const_spec((1, 1)),       # b3
        ],
        out_specs=pl.BlockSpec((TB, 2), lambda i: (i, 0)),
        compiler_params=pltpu.CompilerParams(
            dimension_semantics=("parallel",)),
    )(u, q, q0, a, b, w1a, w1b, w1c, b1, w2, b2, w3, b3)

    out = out[:B]
    return out[:, 0:1], out[:, 1:2]


def init_params(key, num_users, num_items, embedding_dim=32, layer_sizes=(96, 64)):
    """Deterministic parameter init matching the PyTorch module's shapes."""
    k = jax.random.split(key, 8)
    D = embedding_dim
    sizes = [3 * D] + list(layer_sizes) + [1]
    params = {
        # ScaledEmbedding: normal(0, 1/embedding_dim)
        "user_embedding": (1.0 / D) * jax.random.normal(k[0], (num_users, D), jnp.float32),
        "item_embedding": (1.0 / D) * jax.random.normal(k[1], (num_items, D), jnp.float32),
        # ZeroEmbedding: zeros
        "user_bias": jnp.zeros((num_users, 1), jnp.float32),
        "item_bias": jnp.zeros((num_items, 1), jnp.float32),
    }
    # nn.Linear layers (uniform fan-in init, deterministic via PRNGKey)
    for i in range(3):
        fan_in = sizes[i]
        bound = 1.0 / (fan_in ** 0.5)
        params[f"w{i+1}"] = jax.random.uniform(
            k[2 + 2 * i], (sizes[i], sizes[i + 1]), jnp.float32, -bound, bound)
        params[f"b{i+1}"] = jax.random.uniform(
            k[3 + 2 * i], (1, sizes[i + 1]), jnp.float32, -bound, bound)
    return params


if __name__ == "__main__":
    key = jax.random.PRNGKey(0)
    kp, ku, ki = jax.random.split(key, 3)

    num_users, num_items = 50, 60
    embedding_dim = 32
    batch = 8

    params = init_params(kp, num_users, num_items, embedding_dim, layer_sizes=(96, 64))
    user_ids = jax.random.randint(ku, (batch,), 0, num_users, dtype=jnp.int32)
    item_ids = jax.random.randint(ki, (batch,), 0, num_items, dtype=jnp.int32)

    predictions, score = multitask_net_forward(user_ids, item_ids, params)
    jax.block_until_ready((predictions, score))

    # Pure-JAX f32 reference (mirrors the PyTorch forward exactly).
    u = params["user_embedding"][user_ids]
    q = params["item_embedding"][item_ids]
    a = params["user_bias"][user_ids]
    b = params["item_bias"][item_ids]
    pred_ref = (u @ q.T)[:, 0].reshape(-1, 1) + a + b
    x = jnp.concatenate([u, q, u * q], axis=-1)
    h = jnp.maximum(x @ params["w1"] + params["b1"], 0.0)
    h = jnp.maximum(h @ params["w2"] + params["b2"], 0.0)
    score_ref = h @ params["w3"] + params["b3"]

    assert predictions.shape == (batch, 1) and score.shape == (batch, 1)
    # prediction path is computed entirely in f32 -> tight tolerance
    assert jnp.allclose(predictions, pred_ref, atol=1e-5)
    # MLP uses bf16 MXU inputs with f32 accumulation -> slightly looser tolerance
    assert jnp.allclose(score, score_ref, atol=2e-3)
    print("KERNEL_OK")
</pallas_src>

<mosaic_0001>
module attributes {stable_mosaic.version = 11 : i64} {
  func.func @_multitask_kernel(%arg0: i32, %arg1: memref<8x32xf32, #tpu.memory_space<vmem>>, %arg2: memref<8x32xf32, #tpu.memory_space<vmem>>, %arg3: memref<1x32xf32, #tpu.memory_space<vmem>>, %arg4: memref<8x1xf32, #tpu.memory_space<vmem>>, %arg5: memref<8x1xf32, #tpu.memory_space<vmem>>, %arg6: memref<32x96xbf16, #tpu.memory_space<vmem>>, %arg7: memref<32x96xbf16, #tpu.memory_space<vmem>>, %arg8: memref<32x96xbf16, #tpu.memory_space<vmem>>, %arg9: memref<1x96xf32, #tpu.memory_space<vmem>>, %arg10: memref<96x64xbf16, #tpu.memory_space<vmem>>, %arg11: memref<1x64xf32, #tpu.memory_space<vmem>>, %arg12: memref<1x64xf32, #tpu.memory_space<vmem>>, %arg13: memref<1x1xf32, #tpu.memory_space<vmem>>, %arg14: memref<8x2xf32, #tpu.memory_space<vmem>>) attributes {dimension_semantics = [#tpu.dimension_semantics<parallel>], iteration_bounds = array<i64: 1>, scalar_prefetch = 0 : i64, scratch_operands = 0 : i64, tpu.core_type = #tpu.core_type<tc>, window_params = [{transform_indices = @transform_0, window_bounds = array<i64: 8, 32>}, {transform_indices = @transform_1, window_bounds = array<i64: 8, 32>}, {pipeline_mode = #tpu.pipeline_mode<synchronous>, transform_indices = @transform_2, window_bounds = array<i64: 1, 32>}, {transform_indices = @transform_3, window_bounds = array<i64: 8, 1>}, {transform_indices = @transform_4, window_bounds = array<i64: 8, 1>}, {pipeline_mode = #tpu.pipeline_mode<synchronous>, transform_indices = @transform_5, window_bounds = array<i64: 32, 96>}, {pipeline_mode = #tpu.pipeline_mode<synchronous>, transform_indices = @transform_6, window_bounds = array<i64: 32, 96>}, {pipeline_mode = #tpu.pipeline_mode<synchronous>, transform_indices = @transform_7, window_bounds = array<i64: 32, 96>}, {pipeline_mode = #tpu.pipeline_mode<synchronous>, transform_indices = @transform_8, window_bounds = array<i64: 1, 96>}, {pipeline_mode = #tpu.pipeline_mode<synchronous>, transform_indices = @transform_9, window_bounds = array<i64: 96, 64>}, {pipeline_mode = #tpu.pipeline_mode<synchronous>, transform_indices = @transform_10, window_bounds = array<i64: 1, 64>}, {pipeline_mode = #tpu.pipeline_mode<synchronous>, transform_indices = @transform_11, window_bounds = array<i64: 1, 64>}, {pipeline_mode = #tpu.pipeline_mode<synchronous>, transform_indices = @transform_12, window_bounds = array<i64: 1, 1>}, {transform_indices = @transform_13, window_bounds = array<i64: 8, 2>}]} {
    %c0 = arith.constant 0 : index
    %c0_0 = arith.constant 0 : index
    %0 = vector.load %arg1[%c0, %c0_0] : memref<8x32xf32, #tpu.memory_space<vmem>>, vector<8x32xf32>
    %c0_1 = arith.constant 0 : index
    %c0_2 = arith.constant 0 : index
    %1 = vector.load %arg2[%c0_1, %c0_2] : memref<8x32xf32, #tpu.memory_space<vmem>>, vector<8x32xf32>
    %2 = arith.mulf %0, %1 : vector<8x32xf32>
    %c0_3 = arith.constant 0 : index
    %c0_4 = arith.constant 0 : index
    %3 = vector.load %arg3[%c0_3, %c0_4] : memref<1x32xf32, #tpu.memory_space<vmem>>, vector<1x32xf32>
    %4 = vector.broadcast %3 : vector<1x32xf32> to vector<8x32xf32>
    %5 = arith.mulf %0, %4 : vector<8x32xf32>
    %cst = arith.constant dense<0.000000e+00> : vector<8xf32>
    %6 = vector.multi_reduction <add>, %5, %cst [1] : vector<8x32xf32> to vector<8xf32>
    %7 = vector.shape_cast %6 : vector<8xf32> to vector<8x1xf32>
    %c0_5 = arith.constant 0 : index
    %c0_6 = arith.constant 0 : index
    %8 = vector.load %arg4[%c0_5, %c0_6] : memref<8x1xf32, #tpu.memory_space<vmem>>, vector<8x1xf32>
    %9 = arith.addf %7, %8 : vector<8x1xf32>
    %c0_7 = arith.constant 0 : index
    %c0_8 = arith.constant 0 : index
    %10 = vector.load %arg5[%c0_7, %c0_8] : memref<8x1xf32, #tpu.memory_space<vmem>>, vector<8x1xf32>
    %11 = arith.addf %9, %10 : vector<8x1xf32>
    %12 = arith.truncf %0 : vector<8x32xf32> to vector<8x32xbf16>
    %c0_9 = arith.constant 0 : index
    %c0_10 = arith.constant 0 : index
    %13 = vector.load %arg6[%c0_9, %c0_10] : memref<32x96xbf16, #tpu.memory_space<vmem>>, vector<32x96xbf16>
    %cst_11 = arith.constant dense<0.000000e+00> : vector<8x96xf32>
    %14 = tpu.matmul %12, %13, %cst_11 {dimension_numbers = #tpu.dot_dimension_numbers<[1], [0], [0], [1], [0, 0, 1, 1], [], []>} : vector<8x32xbf16>, vector<32x96xbf16>, vector<8x96xf32> -> vector<8x96xf32>
    %15 = arith.truncf %1 : vector<8x32xf32> to vector<8x32xbf16>
    %c0_12 = arith.constant 0 : index
    %c0_13 = arith.constant 0 : index
    %16 = vector.load %arg7[%c0_12, %c0_13] : memref<32x96xbf16, #tpu.memory_space<vmem>>, vector<32x96xbf16>
    %cst_14 = arith.constant dense<0.000000e+00> : vector<8x96xf32>
    %17 = tpu.matmul %15, %16, %cst_14 {dimension_numbers = #tpu.dot_dimension_numbers<[1], [0], [0], [1], [0, 0, 1, 1], [], []>} : vector<8x32xbf16>, vector<32x96xbf16>, vector<8x96xf32> -> vector<8x96xf32>
    %18 = arith.addf %14, %17 : vector<8x96xf32>
    %19 = arith.truncf %2 : vector<8x32xf32> to vector<8x32xbf16>
    %c0_15 = arith.constant 0 : index
    %c0_16 = arith.constant 0 : index
    %20 = vector.load %arg8[%c0_15, %c0_16] : memref<32x96xbf16, #tpu.memory_space<vmem>>, vector<32x96xbf16>
    %cst_17 = arith.constant dense<0.000000e+00> : vector<8x96xf32>
    %21 = tpu.matmul %19, %20, %cst_17 {dimension_numbers = #tpu.dot_dimension_numbers<[1], [0], [0], [1], [0, 0, 1, 1], [], []>} : vector<8x32xbf16>, vector<32x96xbf16>, vector<8x96xf32> -> vector<8x96xf32>
    %22 = arith.addf %18, %21 : vector<8x96xf32>
    %c0_18 = arith.constant 0 : index
    %c0_19 = arith.constant 0 : index
    %23 = vector.load %arg9[%c0_18, %c0_19] : memref<1x96xf32, #tpu.memory_space<vmem>>, vector<1x96xf32>
    %24 = vector.broadcast %23 : vector<1x96xf32> to vector<8x96xf32>
    %25 = arith.addf %22, %24 : vector<8x96xf32>
    %cst_20 = arith.constant 0.000000e+00 : f32
    %26 = vector.broadcast %cst_20 : f32 to vector<8x96xf32>
    %27 = arith.maximumf %25, %26 : vector<8x96xf32>
    %28 = arith.truncf %27 : vector<8x96xf32> to vector<8x96xbf16>
    %c0_21 = arith.constant 0 : index
    %c0_22 = arith.constant 0 : index
    %29 = vector.load %arg10[%c0_21, %c0_22] : memref<96x64xbf16, #tpu.memory_space<vmem>>, vector<96x64xbf16>
    %cst_23 = arith.constant dense<0.000000e+00> : vector<8x64xf32>
    %30 = tpu.matmul %28, %29, %cst_23 {dimension_numbers = #tpu.dot_dimension_numbers<[1], [0], [0], [1], [0, 0, 1, 1], [], []>} : vector<8x96xbf16>, vector<96x64xbf16>, vector<8x64xf32> -> vector<8x64xf32>
    %c0_24 = arith.constant 0 : index
    %c0_25 = arith.constant 0 : index
    %31 = vector.load %arg11[%c0_24, %c0_25] : memref<1x64xf32, #tpu.memory_space<vmem>>, vector<1x64xf32>
    %32 = vector.broadcast %31 : vector<1x64xf32> to vector<8x64xf32>
    %33 = arith.addf %30, %32 : vector<8x64xf32>
    %cst_26 = arith.constant 0.000000e+00 : f32
    %34 = vector.broadcast %cst_26 : f32 to vector<8x64xf32>
    %35 = arith.maximumf %33, %34 : vector<8x64xf32>
    %c0_27 = arith.constant 0 : index
    %c0_28 = arith.constant 0 : index
    %36 = vector.load %arg12[%c0_27, %c0_28] : memref<1x64xf32, #tpu.memory_space<vmem>>, vector<1x64xf32>
    %37 = vector.broadcast %36 : vector<1x64xf32> to vector<8x64xf32>
    %38 = arith.mulf %35, %37 : vector<8x64xf32>
    %cst_29 = arith.constant dense<0.000000e+00> : vector<8xf32>
    %39 = vector.multi_reduction <add>, %38, %cst_29 [1] : vector<8x64xf32> to vector<8xf32>
    %40 = vector.shape_cast %39 : vector<8xf32> to vector<8x1xf32>
    %c0_30 = arith.constant 0 : index
    %c0_31 = arith.constant 0 : index
    %41 = vector.load %arg13[%c0_30, %c0_31] : memref<1x1xf32, #tpu.memory_space<vmem>>, vector<1x1xf32>
    %42 = vector.broadcast %41 : vector<1x1xf32> to vector<8x1xf32>
    %43 = arith.addf %40, %42 : vector<8x1xf32>
    %44 = tpu.concatenate %11, %43 in 1 : vector<8x1xf32>, vector<8x1xf32> -> vector<8x2xf32>
    %c0_32 = arith.constant 0 : index
    %c0_33 = arith.constant 0 : index
    %45 = vector.load %arg14[%c0_32, %c0_33] : memref<8x2xf32, #tpu.memory_space<vmem>>, vector<8x2xf32>
    tpu.vector_store %arg14[%c0_32, %c0_33], %44 {strides = array<i32>} : memref<8x2xf32, #tpu.memory_space<vmem>>, vector<8x2xf32>,
    return
  }
  func.func @transform_0(%arg0: i32) -> (i32, i32) {
    %c0_i32 = arith.constant 0 : i32
    %c0_i32_0 = arith.constant 0 : i32
    return %arg0, %c0_i32 : i32, i32
  }
  func.func @transform_1(%arg0: i32) -> (i32, i32) {
    %c0_i32 = arith.constant 0 : i32
    %c0_i32_0 = arith.constant 0 : i32
    return %arg0, %c0_i32 : i32, i32
  }
  func.func @transform_2(%arg0: i32) -> (i32, i32) {
    %c0_i32 = arith.constant 0 : i32
    %c0_i32_0 = arith.constant 0 : i32
    %c0_i32_1 = arith.constant 0 : i32
    return %c0_i32, %c0_i32_0 : i32, i32
  }
  func.func @transform_3(%arg0: i32) -> (i32, i32) {
    %c0_i32 = arith.constant 0 : i32
    %c0_i32_0 = arith.constant 0 : i32
    return %arg0, %c0_i32 : i32, i32
  }
  func.func @transform_4(%arg0: i32) -> (i32, i32) {
    %c0_i32 = arith.constant 0 : i32
    %c0_i32_0 = arith.constant 0 : i32
    return %arg0, %c0_i32 : i32, i32
  }
  func.func @transform_5(%arg0: i32) -> (i32, i32) {
    %c0_i32 = arith.constant 0 : i32
    %c0_i32_0 = arith.constant 0 : i32
    %c0_i32_1 = arith.constant 0 : i32
    return %c0_i32, %c0_i32_0 : i32, i32
  }
  func.func @transform_6(%arg0: i32) -> (i32, i32) {
    %c0_i32 = arith.constant 0 : i32
    %c0_i32_0 = arith.constant 0 : i32
    %c0_i32_1 = arith.constant 0 : i32
    return %c0_i32, %c0_i32_0 : i32, i32
  }
  func.func @transform_7(%arg0: i32) -> (i32, i32) {
    %c0_i32 = arith.constant 0 : i32
    %c0_i32_0 = arith.constant 0 : i32
    %c0_i32_1 = arith.constant 0 : i32
    return %c0_i32, %c0_i32_0 : i32, i32
  }
  func.func @transform_8(%arg0: i32) -> (i32, i32) {
    %c0_i32 = arith.constant 0 : i32
    %c0_i32_0 = arith.constant 0 : i32
    %c0_i32_1 = arith.constant 0 : i32
    return %c0_i32, %c0_i32_0 : i32, i32
  }
  func.func @transform_9(%arg0: i32) -> (i32, i32) {
    %c0_i32 = arith.constant 0 : i32
    %c0_i32_0 = arith.constant 0 : i32
    %c0_i32_1 = arith.constant 0 : i32
    return %c0_i32, %c0_i32_0 : i32, i32
  }
  func.func @transform_10(%arg0: i32) -> (i32, i32) {
    %c0_i32 = arith.constant 0 : i32
    %c0_i32_0 = arith.constant 0 : i32
    %c0_i32_1 = arith.constant 0 : i32
    return %c0_i32, %c0_i32_0 : i32, i32
  }
  func.func @transform_11(%arg0: i32) -> (i32, i32) {
    %c0_i32 = arith.constant 0 : i32
    %c0_i32_0 = arith.constant 0 : i32
    %c0_i32_1 = arith.constant 0 : i32
    return %c0_i32, %c0_i32_0 : i32, i32
  }
  func.func @transform_12(%arg0: i32) -> (i32, i32) {
    %c0_i32 = arith.constant 0 : i32
    %c0_i32_0 = arith.constant 0 : i32
    %c0_i32_1 = arith.constant 0 : i32
    return %c0_i32, %c0_i32_0 : i32, i32
  }
  func.func @transform_13(%arg0: i32) -> (i32, i32) {
    %c0_i32 = arith.constant 0 : i32
    %c0_i32_0 = arith.constant 0 : i32
    return %arg0, %c0_i32 : i32, i32
  }
}

</mosaic_0001>

<bundles_post_ra>
// kernel: tpu_custom_call.1
= control target key start
LH: loop header
LB: loop body
LE: loop exit
PB: predicated region body
PF: predicated region fallthrough
CT: control target
= control target key end

     0   :  { %v481_v0 = vmov 0.0   ;;  %vm482_vm0 = vmmov 0   ;;  %vm58_vm1 = vcmask 261120   ;;  %vm312_vm2 = vcmask 785408   ;;  %s634_s6 = inlined_call_operand.vmem [shape: bf16[32,96], index: 6, kind: input, shape index: {}]   ;;  %s635_s1 = inlined_call_operand.vmem [shape: f32[8,32], index: 1, kind: input, shape index: {}]   ;;  %s636_s5 = inlined_call_operand.vmem [shape: bf16[32,96], index: 5, kind: input, shape index: {}]   ;;  %s637_s7 = inlined_call_operand.vmem [shape: bf16[32,96], index: 7, kind: input, shape index: {}]   ;;  %s638_s0 = inlined_call_operand.vmem [shape: f32[8,32], index: 0, kind: input, shape index: {}]   ;;  %s639_s9 = inlined_call_operand.vmem [shape: bf16[96,64], index: 9, kind: input, shape index: {}]   ;;  %s640_s8 = inlined_call_operand.vmem [shape: f32[1,96], index: 8, kind: input, shape index: {}]   ;;  %s641_s12 = inlined_call_operand.<no memory space> [shape: f32[1,1], index: 12, kind: input, shape index: {}]   ;;  %s642_s10 = inlined_call_operand.vmem [shape: f32[1,64], index: 10, kind: input, shape index: {}]   ;;  %s643_s11 = inlined_call_operand.vmem [shape: f32[1,64], index: 11, kind: input, shape index: {}]   ;;  %s644_s2 = inlined_call_operand.vmem [shape: f32[1,32], index: 2, kind: input, shape index: {}]   ;;  %s645_s3 = inlined_call_operand.vmem [shape: f32[8,1], index: 3, kind: input, shape index: {}]   ;;  %s646_s4 = inlined_call_operand.vmem [shape: f32[8,1], index: 4, kind: input, shape index: {}]   ;;  %s647_s13 = inlined_call_operand.vmem [shape: f32[8,2], index: 13, kind: output, shape index: {}]  }
   0x1   :  { %426 = vmatprep.subr.bf16.mxu0 %v481_v0  ;;  %v469_v1 = vld [vmem:[%s634_s6] sm:$0xff]   ;;  %430 = vmatprep.mubr.msk.bf16.mxu0 %vm482_vm0, %v481_v0  ;;  %v470_v2 = vld [vmem:[%s634_s6 + $0x8] sm:$0xff]   ;;  %v477_v15 = vld [vmem:[%s639_s9 + $0x10] sm:$0xff]   ;;  %v18_v37 = vstv %s641_s12  ;;  %vm365_vm3 = vcmask 523264   ;;  %vm381_vm4 = vcmask 7168   ;;  %vm383_vm5 = vcmask 15360  }
   0x2   :  { %450 = vmatprep.subr.bf16.mxu1 %v481_v0  ;;  %462 = vmatprep.mubr.msk.bf16.mxu1 %vm482_vm0, %v481_v0  ;;  %v48_v3 = vld [vmem:[%s635_s1] sm:$0xff]  ;;  %v472_v7 = vld [vmem:[%s636_s5 + $0x8] sm:$0xff]   ;;  %v478_v16 = vld [vmem:[%s639_s9 + $0x18] sm:$0xff]   ;;  %19 = vst [vmem:[#allocation2] sm:$0x1] %v18_v37 }
   0x3   :  { %427 = vmatpush3.bf16.msra.mxu0 %v469_v1  ;;  %v71_v4 = vpack.c.bf16 %v48_v3, %v48_v3  ;;  %v471_v5 = vld [vmem:[%s636_s5] sm:$0xff]   ;;  %v474_v11 = vld [vmem:[%s637_s7 + $0x8] sm:$0xff]  }
   0x4   :  { %428 = vmatprep.subr.bf16.mxu0 %v481_v0  ;;  %v572_v6 = vld [vmem:[%s638_s0] sm:$0xff]  ;;  %v476_v14 = vld [vmem:[%s639_s9 + $0x8] sm:$0xff]  }
   0x5   :  { %v66_v8 = vpack.c.bf16 %v572_v6, %v572_v6  ;;  %v473_v9 = vld [vmem:[%s637_s7] sm:$0xff]   ;;  %v49_v10 = vmul.f32 %v48_v3, %v572_v6  ;;  %v480_v18 = vld [vmem:[%s639_s9 + $0x28] sm:$0xff]  }
   0x6   :  { %v475_v13 = vld [vmem:[%s639_s9] sm:$0xff]  }
   0x7   :  { %429 = vmatpush3.bf16.msra.mxu0 %v470_v2  ;;  %v186_v12 = vpack.c.bf16 %v49_v10, %v49_v10  ;;  %451 = vmatpush3.bf16.msra.mxu1 %v475_v13  ;;  %v479_v17 = vld [vmem:[%s639_s9 + $0x20] sm:$0xff]  }
   0x8   :  { %434 = vmatprep.subr.bf16.mxu0 %v481_v0  ;;  %452 = vmatprep.subr.bf16.mxu1 %v481_v0  ;;  %v399_v29 = vld [vmem:[%s640_s8] ss:$0 sm:$0xff] }
   0x9   :  { %v400_v38 = vld [vmem:[%s642_s10] ss:$0 sm:$0xff]  ;;  %s483_s10 = smov 1  }
   0xa   :  { %431 = vmatmul.mubr.msk.bf16.vlgmr.msra.gmra.mrb[0].mxu0 %vm58_vm1, %v71_v4  ;;  %v408_v43 = vld [vmem:[%s643_s11] ss:$0 sm:$0xff] }
   0xb   :  { %435 = vmatpush3.bf16.msra.mxu0 %v471_v5  ;;  %438 = vmatprep.mubr.msk.bf16.mxu0 %vm482_vm0, %v481_v0  ;;  %v389_v44 = vld [vmem:[%s644_s2] ss:$0 sm:$0xff] }
   0xc   :  { %436 = vmatprep.subr.bf16.mxu0 %v481_v0  ;;  %453 = vmatpush3.bf16.msra.mxu1 %v476_v14  ;;  %v57_v48 = vmul.f32 %v389_v44, %v572_v6  ;;  %v409_v51 = vld [vmem:[#allocation2] ss:$0 sm:$0xff] }
   0xd   :  { %454 = vmatprep.subr.bf16.mxu1 %v481_v0  ;;  %v62_v54 = vld [vmem:[%s645_s3] sm:$0xff] }
   0xe   :  { %v59_v50 = vsel %vm58_vm1, %v57_v48, 0.0  ;;  %v64_v57 = vld [vmem:[%s646_s4] sm:$0xff] }
   0xf   :  { %437 = vmatpush3.bf16.msra.mxu0 %v472_v7 }
  0x10   :  { %442 = vmatprep.subr.bf16.mxu0 %v481_v0  ;;  %455 = vmatpush3.bf16.msra.mxu1 %v477_v15 }
  0x11   :  { %456 = vmatprep.subr.bf16.mxu1 %v481_v0 }
  0x12   :  { %439 = vmatmul.mubr.msk.bf16.vlgmr.msra.gmra.mrb[4].mxu0 %vm58_vm1, %v66_v8 }
  0x13   :  { %443 = vmatpush3.bf16.msra.mxu0 %v473_v9  ;;  %446 = vmatprep.mubr.msk.bf16.mxu0 %vm482_vm0, %v481_v0 }
  0x14   :  { %444 = vmatprep.subr.bf16.mxu0 %v481_v0  ;;  %457 = vmatpush3.bf16.msra.mxu1 %v478_v16 }
  0x15   :  { %458 = vmatprep.subr.bf16.mxu1 %v481_v0 }
  0x17   :  { %445 = vmatpush3.bf16.msra.mxu0 %v474_v11 }
  0x18   :  { %459 = vmatpush3.bf16.msra.mxu1 %v479_v17 }
  0x19   :  { %460 = vmatprep.subr.bf16.mxu1 %v481_v0 }
  0x1a   :  { %447 = vmatmul.mubr.msk.bf16.vlgmr.msra.gmra.mrb[8].mxu0 %vm58_vm1, %v186_v12 }
  0x1c   :  { %461 = vmatpush3.bf16.msra.mxu1 %v480_v18 }
  0xdd   :  { %v125_v19 = vpop.f32.mrb[0].mxu0 }
  0xde   :  { %v432_v20 = vpop.f32.mrb[1].mxu0 }
  0xdf   :  { %v128_v21 = vpop.f32.mrb[2].mxu0 }
  0xe0   :  { %v433_v22 = vpop.f32.mrb[3].mxu0 }
  0xe5   :  { %v180_v23 = vpop.f32.mrb[4].mxu0 }
  0xe6   :  { %v181_v24 = vadd.f32 %v180_v23, %v125_v19  ;;  %v440_v25 = vpop.f32.mrb[5].mxu0 }
  0xe7   :  { %v183_v26 = vpop.f32.mrb[6].mxu0 }
  0xe8   :  { %v441_v27 = vpop.f32.mrb[7].mxu0 }
  0xed   :  { %v240_v28 = vpop.f32.mrb[8].mxu0 }
  0xee   :  { %v246_v30 = vadd.f32 %v240_v28, %v181_v24  ;;  %v448_v31 = vpop.f32.mrb[9].mxu0 }
  0xef   :  { %v243_v32 = vpop.f32.mrb[10].mxu0 }
  0xf0   :  { %v254_v33 = vadd.f32 %v399_v29, %v246_v30  ;;  %v449_v34 = vpop.f32.mrb[11].mxu0 }
  0xf2   :  { %v255_v35 = vmax.f32 %v254_v33, 0.0 }
  0xf4   :  { %v256_v36 = vpack.c.bf16 %v255_v35, %v255_v35 }
  0xf6   :  { %463 = vmatmul.mubr.msk.bf16.vlgmr.msra.gmra.mrb[0].mxu1 %vm312_vm2, %v256_v36 }
 0x1c9   :  { %v350_v39 = vpop.f32.mrb[0].mxu1 }
 0x1ca   :  { %v351_v40 = vadd.f32 %v400_v38, %v350_v39  ;;  %v464_v41 = vpop.f32.mrb[1].mxu1 }
 0x1cb   :  { %v353_v42 = vpop.f32.mrb[2].mxu1 }
 0x1cc   :  { %v356_v45 = vmax.f32 %v351_v40, 0.0  ;;  %v465_v46 = vpop.f32.mrb[3].mxu1 }
 0x1ce   :  { %v364_v47 = vmul.f32 %v408_v43, %v356_v45 }
 0x1d0   :  { %v366_v49 = vsel %vm365_vm3, %v364_v47, 0.0 }
 0x1d1   :  { %367 = vadd.xlane.f32.xlu0 %v366_v49 }
 0x1d5   :  { %60 = vadd.xlane.f32.xlu0 %v59_v50 }
 0x25e   :  { %v368_v52 = vpop.xlane.xlu0 %367 }
 0x25f   :  { %v376_v53 = vadd.f32 %v409_v51, %v368_v52 }
 0x261   :  { %378 = vrot.lane.b32.xlu1 %v376_v53, %s483_s10 }
 0x262   :  { %v61_v55 = vpop.xlane.xlu0 %60 }
 0x263   :  { %v63_v56 = vadd.f32 %v62_v54, %v61_v55 }
 0x265   :  { %v65_v58 = vadd.f32 %v64_v57, %v63_v56 }
 0x2d3   :  { %v379_v59 = vpop.permute.xlu1 %378 }
 0x2d4   :  { %v382_v60 = vsel %vm381_vm4, %v65_v58, %v379_v59 }
 0x2d5   :  { %384 = vst.msk [vmem:[%s647_s13] sm:$0xff] %vm383_vm5, %v382_v60 }

</bundles_post_ra>
